<compile_context>
chip_gen: v5e
topology: v5e:2x2
jax: 0.10.0
libtpu: 0.0.40
codegen_flags: <defaults>
</compile_context>

<pallas_src>
import functools

import jax
import jax.numpy as jnp
from jax.experimental import pallas as pl
from jax.experimental.pallas import tpu as pltpu


def _log_sigmoid(x):
    # Numerically stable log(sigmoid(x)) = min(x, 0) - log1p(exp(-|x|))
    return jnp.minimum(x, 0.0) - jnp.log1p(jnp.exp(-jnp.abs(x)))


def _transe_loss_kernel(q_ref, a_ref, qn_ref, an_ref, out_ref, *,
                        margin, batch, num_neg, block_b):
    """One batch tile: emits a per-tile partial of the final mean loss."""
    i = pl.program_id(0)

    q = q_ref[...].astype(jnp.float32)      # (TB, D)
    a = a_ref[...].astype(jnp.float32)      # (TB, D)
    qn = qn_ref[...].astype(jnp.float32)    # (TB*N, D)
    an = an_ref[...].astype(jnp.float32)    # (TB*N, D)

    # distance_TransE: L1 norm over the embedding (lane) dim.
    d_pos = jnp.sum(jnp.abs(q - a), axis=-1, keepdims=True)     # (TB, 1)
    d_neg = jnp.sum(jnp.abs(qn - an), axis=-1, keepdims=True)   # (TB*N, 1)

    loss_pos = -_log_sigmoid(margin - d_pos)                    # (TB, 1)
    loss_neg = -_log_sigmoid(d_neg - margin)                    # (TB*N, 1)

    # Mask rows in the overhang of a partial last tile.  The overhang holds
    # unspecified data, so use where() (select) which is robust to NaN/Inf.
    pos_row = (jax.lax.broadcasted_iota(jnp.int32, loss_pos.shape, 0)
               + i * block_b)
    neg_row = (jax.lax.broadcasted_iota(jnp.int32, loss_neg.shape, 0)
               + i * block_b * num_neg)
    loss_pos = jnp.where(pos_row < batch, loss_pos, 0.0)
    loss_neg = jnp.where(neg_row < batch * num_neg, loss_neg, 0.0)

    # Divide by the true *global* counts here; the wrapper only sums the
    # per-tile partials, so the result is the exact global mean.
    partial = 0.5 * (jnp.sum(loss_pos, axis=0, keepdims=True) / float(batch)
                     + jnp.sum(loss_neg, axis=0, keepdims=True)
                     / float(batch * num_neg))                  # (1, 1)

    # Lane-dense (8, 128) block per tile -> unmasked stores, and each tile
    # owns its own output block so the grid axis can be "parallel".
    out_ref[...] = jnp.broadcast_to(partial, out_ref.shape)


def _vmem_capacity_bytes():
    try:
        return int(pltpu.get_tpu_info().vmem_capacity_bytes)
    except Exception:
        # Conservative fallback (v7x has 64 MiB per TensorCore).
        return 64 * 1024 * 1024


def _choose_block_b(batch, num_neg, emb_dim, itemsize, sublane):
    """Largest batch tile whose double-buffered inputs fit in ~half of VMEM."""
    budget = _vmem_capacity_bytes() // 2
    # Per batch row per pipeline buffer: 1 q row + 1 a row + N qn + N an rows.
    bytes_per_row = itemsize * emb_dim * (2 + 2 * num_neg)
    tb = budget // (2 * bytes_per_row)             # 2 pipeline buffers
    tb = max(sublane, (tb // sublane) * sublane)
    tb = min(tb, 1024)                             # diminishing returns beyond ~1K rows
    tb = min(tb, -(-batch // sublane) * sublane)   # don't exceed (aligned) batch
    return int(tb)


def transe_loss(query_emb, query_emb_neg, answer_emb, answer_emb_neg,
                margin=1.0, block_b=None):
    """Pallas TPU implementation of EmbeddingLossTransE.forward."""
    B, D = query_emb.shape
    Bn, N, Dn = query_emb_neg.shape
    assert (Bn, Dn) == (B, D)
    assert answer_emb.shape == (B, D)
    assert answer_emb_neg.shape == (B, N, D)

    itemsize = jnp.dtype(query_emb_neg.dtype).itemsize
    sublane = 8 if itemsize >= 4 else 16          # bf16/fp16 pack 16 sublanes
    if block_b is None:
        block_b = _choose_block_b(B, N, D, itemsize, sublane)
    block_b = max(sublane, -(-int(block_b) // sublane) * sublane)
    num_tiles = pl.cdiv(B, block_b)

    # Flatten negatives: clean 2-D (8,128)-aligned blocks, D stays on lanes.
    qn2 = query_emb_neg.reshape(B * N, D)
    an2 = answer_emb_neg.reshape(B * N, D)

    kernel = functools.partial(
        _transe_loss_kernel, margin=float(margin), batch=B, num_neg=N,
        block_b=block_b)

    cost = pl.CostEstimate(
        flops=int(3 * B * D * (N + 1)),
        transcendentals=int(2 * B * (N + 1)),
        bytes_accessed=int(2 * (B * D + B * N * D) * itemsize
                           + num_tiles * 8 * 128 * 4),
    )

    out = pl.pallas_call(
        kernel,
        out_shape=jax.ShapeDtypeStruct((num_tiles * 8, 128), jnp.float32),
        grid=(num_tiles,),
        in_specs=[
            pl.BlockSpec((block_b, D), lambda i: (i, 0)),        # query_emb
            pl.BlockSpec((block_b, D), lambda i: (i, 0)),        # answer_emb
            pl.BlockSpec((block_b * N, D), lambda i: (i, 0)),    # query_emb_neg
            pl.BlockSpec((block_b * N, D), lambda i: (i, 0)),    # answer_emb_neg
        ],
        out_specs=pl.BlockSpec((8, 128), lambda i: (i, 0)),
        compiler_params=pltpu.CompilerParams(
            dimension_semantics=("parallel",),
            vmem_limit_bytes=int(_vmem_capacity_bytes() * 3 // 4),
        ),
        cost_estimate=cost,
    )(query_emb, answer_emb, qn2, an2)

    # Every element of a tile's (8, 128) block holds the same partial value;
    # pick one per tile and sum (in-kernel division already used global B).
    partials = out.reshape(num_tiles, 8, 128)[:, 0, 0]
    return jnp.sum(partials)


def _reference_loss(q, qn, a, an, margin):
    d_pos = jnp.sum(jnp.abs(q - a), axis=-1)
    d_neg = jnp.sum(jnp.abs(qn - an), axis=-1)
    lp = -jax.nn.log_sigmoid(margin - d_pos)
    ln = jnp.mean(-jax.nn.log_sigmoid(d_neg - margin), axis=1)
    return jnp.mean(0.5 * (lp + ln))


if __name__ == "__main__":
    margin = 1.0  # the module's only "parameter"

    # Small shapes; B deliberately not a multiple of the tile so the
    # partial-tile masking path is exercised.
    B, N, D = 20, 6, 128
    key = jax.random.PRNGKey(0)
    k1, k2, k3, k4 = jax.random.split(key, 4)
    query_emb = jax.random.normal(k1, (B, D), dtype=jnp.float32)
    answer_emb = jax.random.normal(k2, (B, D), dtype=jnp.float32)
    query_emb_neg = jax.random.normal(k3, (B, N, D), dtype=jnp.float32)
    answer_emb_neg = jax.random.normal(k4, (B, N, D), dtype=jnp.float32)

    ref = _reference_loss(query_emb, query_emb_neg, answer_emb,
                          answer_emb_neg, margin)

    # 1) auto-sized tile (single tile at these shapes).
    loss = transe_loss(query_emb, query_emb_neg, answer_emb, answer_emb_neg,
                       margin=margin)
    loss = jax.block_until_ready(loss)
    assert jnp.allclose(loss, ref, rtol=1e-5, atol=1e-5), (loss, ref)

    # 2) forced small tile -> multi-tile grid + partial last tile, exercising
    #    the pipelined / masked accumulation path.
    loss_tiled = transe_loss(query_emb, query_emb_neg, answer_emb,
                             answer_emb_neg, margin=margin, block_b=8)
    loss_tiled = jax.block_until_ready(loss_tiled)
    assert jnp.allclose(loss_tiled, ref, rtol=1e-5, atol=1e-5), (loss_tiled, ref)

    print("KERNEL_OK")
</pallas_src>

<mosaic_0001>
module attributes {stable_mosaic.version = 11 : i64} {
  func.func @_transe_loss_kernel(%arg0: i32, %arg1: memref<24x128xf32, #tpu.memory_space<vmem>>, %arg2: memref<24x128xf32, #tpu.memory_space<vmem>>, %arg3: memref<144x128xf32, #tpu.memory_space<vmem>>, %arg4: memref<144x128xf32, #tpu.memory_space<vmem>>, %arg5: memref<8x128xf32, #tpu.memory_space<vmem>>) attributes {dimension_semantics = [#tpu.dimension_semantics<parallel>], iteration_bounds = array<i64: 1>, scalar_prefetch = 0 : i64, scratch_operands = 0 : i64, tpu.core_type = #tpu.core_type<tc>, window_params = [{transform_indices = @transform_0, window_bounds = array<i64: 24, 128>}, {transform_indices = @transform_1, window_bounds = array<i64: 24, 128>}, {transform_indices = @transform_2, window_bounds = array<i64: 144, 128>}, {transform_indices = @transform_3, window_bounds = array<i64: 144, 128>}, {transform_indices = @transform_4, window_bounds = array<i64: 8, 128>}]} {
    %c0 = arith.constant 0 : index
    %c0_0 = arith.constant 0 : index
    %0 = vector.load %arg1[%c0, %c0_0] : memref<24x128xf32, #tpu.memory_space<vmem>>, vector<24x128xf32>
    %c0_1 = arith.constant 0 : index
    %c0_2 = arith.constant 0 : index
    %1 = vector.load %arg2[%c0_1, %c0_2] : memref<24x128xf32, #tpu.memory_space<vmem>>, vector<24x128xf32>
    %c0_3 = arith.constant 0 : index
    %c0_4 = arith.constant 0 : index
    %2 = vector.load %arg3[%c0_3, %c0_4] : memref<144x128xf32, #tpu.memory_space<vmem>>, vector<144x128xf32>
    %c0_5 = arith.constant 0 : index
    %c0_6 = arith.constant 0 : index
    %3 = vector.load %arg4[%c0_5, %c0_6] : memref<144x128xf32, #tpu.memory_space<vmem>>, vector<144x128xf32>
    %4 = arith.subf %0, %1 : vector<24x128xf32>
    %5 = math.absf %4 : vector<24x128xf32>
    %cst = arith.constant dense<0.000000e+00> : vector<24xf32>
    %6 = vector.multi_reduction <add>, %5, %cst [1] : vector<24x128xf32> to vector<24xf32>
    %7 = vector.shape_cast %6 : vector<24xf32> to vector<24x1xf32>
    %8 = arith.subf %2, %3 : vector<144x128xf32>
    %9 = math.absf %8 : vector<144x128xf32>
    %cst_7 = arith.constant dense<0.000000e+00> : vector<144xf32>
    %10 = vector.multi_reduction <add>, %9, %cst_7 [1] : vector<144x128xf32> to vector<144xf32>
    %11 = vector.shape_cast %10 : vector<144xf32> to vector<144x1xf32>
    %cst_8 = arith.constant 1.000000e+00 : f32
    %12 = vector.broadcast %cst_8 : f32 to vector<24x1xf32>
    %13 = arith.subf %12, %7 : vector<24x1xf32>
    %cst_9 = arith.constant 0.000000e+00 : f32
    %14 = vector.broadcast %cst_9 : f32 to vector<24x1xf32>
    %15 = arith.minimumf %13, %14 : vector<24x1xf32>
    %16 = math.absf %13 : vector<24x1xf32>
    %cst_10 = arith.constant 0.000000e+00 : f32
    %17 = vector.broadcast %cst_10 : f32 to vector<24x1xf32>
    %18 = arith.subf %17, %16 : vector<24x1xf32>
    %19 = math.exp %18 : vector<24x1xf32>
    %20 = math.log1p %19 : vector<24x1xf32>
    %21 = arith.subf %15, %20 : vector<24x1xf32>
    %cst_11 = arith.constant 0.000000e+00 : f32
    %22 = vector.broadcast %cst_11 : f32 to vector<24x1xf32>
    %23 = arith.subf %22, %21 : vector<24x1xf32>
    %cst_12 = arith.constant 1.000000e+00 : f32
    %24 = vector.broadcast %cst_12 : f32 to vector<144x1xf32>
    %25 = arith.subf %11, %24 : vector<144x1xf32>
    %cst_13 = arith.constant 0.000000e+00 : f32
    %26 = vector.broadcast %cst_13 : f32 to vector<144x1xf32>
    %27 = arith.minimumf %25, %26 : vector<144x1xf32>
    %28 = math.absf %25 : vector<144x1xf32>
    %cst_14 = arith.constant 0.000000e+00 : f32
    %29 = vector.broadcast %cst_14 : f32 to vector<144x1xf32>
    %30 = arith.subf %29, %28 : vector<144x1xf32>
    %31 = math.exp %30 : vector<144x1xf32>
    %32 = math.log1p %31 : vector<144x1xf32>
    %33 = arith.subf %27, %32 : vector<144x1xf32>
    %cst_15 = arith.constant 0.000000e+00 : f32
    %34 = vector.broadcast %cst_15 : f32 to vector<144x1xf32>
    %35 = arith.subf %34, %33 : vector<144x1xf32>
    %36 = tpu.iota {dimensions = array<i32: 0>} : vector<24x1xi32>
    %c24_i32 = arith.constant 24 : i32
    %37 = arith.muli %arg0, %c24_i32 : i32
    %38 = vector.broadcast %37 : i32 to vector<24x1xi32>
    %39 = arith.addi %36, %38 : vector<24x1xi32>
    %40 = tpu.iota {dimensions = array<i32: 0>} : vector<144x1xi32>
    %c24_i32_16 = arith.constant 24 : i32
    %41 = arith.muli %arg0, %c24_i32_16 : i32
    %c6_i32 = arith.constant 6 : i32
    %42 = arith.muli %41, %c6_i32 : i32
    %43 = vector.broadcast %42 : i32 to vector<144x1xi32>
    %44 = arith.addi %40, %43 : vector<144x1xi32>
    %c20_i32 = arith.constant 20 : i32
    %45 = vector.broadcast %c20_i32 : i32 to vector<24x1xi32>
    %46 = arith.cmpi slt, %39, %45 : vector<24x1xi32>
    %cst_17 = arith.constant 0.000000e+00 : f32
    %47 = vector.broadcast %cst_17 : f32 to vector<24x1xf32>
    %48 = arith.select %46, %23, %47 : vector<24x1xi1>, vector<24x1xf32>
    %c120_i32 = arith.constant 120 : i32
    %49 = vector.broadcast %c120_i32 : i32 to vector<144x1xi32>
    %50 = arith.cmpi slt, %44, %49 : vector<144x1xi32>
    %cst_18 = arith.constant 0.000000e+00 : f32
    %51 = vector.broadcast %cst_18 : f32 to vector<144x1xf32>
    %52 = arith.select %50, %35, %51 : vector<144x1xi1>, vector<144x1xf32>
    %cst_19 = arith.constant dense<0.000000e+00> : vector<1xf32>
    %53 = vector.multi_reduction <add>, %48, %cst_19 [0] : vector<24x1xf32> to vector<1xf32>
    %54 = vector.shape_cast %53 : vector<1xf32> to vector<1x1xf32>
    %cst_20 = arith.constant 2.000000e+01 : f32
    %55 = vector.broadcast %cst_20 : f32 to vector<1x1xf32>
    %56 = arith.divf %54, %55 : vector<1x1xf32>
    %cst_21 = arith.constant dense<0.000000e+00> : vector<1xf32>
    %57 = vector.multi_reduction <add>, %52, %cst_21 [0] : vector<144x1xf32> to vector<1xf32>
    %58 = vector.shape_cast %57 : vector<1xf32> to vector<1x1xf32>
    %cst_22 = arith.constant 1.200000e+02 : f32
    %59 = vector.broadcast %cst_22 : f32 to vector<1x1xf32>
    %60 = arith.divf %58, %59 : vector<1x1xf32>
    %61 = arith.addf %56, %60 : vector<1x1xf32>
    %cst_23 = arith.constant 5.000000e-01 : f32
    %62 = vector.broadcast %cst_23 : f32 to vector<1x1xf32>
    %63 = arith.mulf %62, %61 : vector<1x1xf32>
    %64 = vector.shape_cast %63 : vector<1x1xf32> to vector<1x1xf32>
    %65 = vector.broadcast %64 : vector<1x1xf32> to vector<8x128xf32>
    %c0_24 = arith.constant 0 : index
    %c0_25 = arith.constant 0 : index
    %66 = vector.load %arg5[%c0_24, %c0_25] : memref<8x128xf32, #tpu.memory_space<vmem>>, vector<8x128xf32>
    tpu.vector_store %arg5[%c0_24, %c0_25], %65 {strides = array<i32>} : memref<8x128xf32, #tpu.memory_space<vmem>>, vector<8x128xf32>,
    return
  }
  func.func @transform_0(%arg0: i32) -> (i32, i32) {
    %c0_i32 = arith.constant 0 : i32
    %c0_i32_0 = arith.constant 0 : i32
    return %arg0, %c0_i32 : i32, i32
  }
  func.func @transform_1(%arg0: i32) -> (i32, i32) {
    %c0_i32 = arith.constant 0 : i32
    %c0_i32_0 = arith.constant 0 : i32
    return %arg0, %c0_i32 : i32, i32
  }
  func.func @transform_2(%arg0: i32) -> (i32, i32) {
    %c0_i32 = arith.constant 0 : i32
    %c0_i32_0 = arith.constant 0 : i32
    return %arg0, %c0_i32 : i32, i32
  }
  func.func @transform_3(%arg0: i32) -> (i32, i32) {
    %c0_i32 = arith.constant 0 : i32
    %c0_i32_0 = arith.constant 0 : i32
    return %arg0, %c0_i32 : i32, i32
  }
  func.func @transform_4(%arg0: i32) -> (i32, i32) {
    %c0_i32 = arith.constant 0 : i32
    %c0_i32_0 = arith.constant 0 : i32
    return %arg0, %c0_i32 : i32, i32
  }
}

</mosaic_0001>

<bundles_post_ra>
// kernel: tpu_custom_call.1
= control target key start
LH: loop header
LB: loop body
LE: loop exit
PB: predicated region body
PF: predicated region fallthrough
CT: control target
= control target key end

     0   :  { %9 = vsyncpa [#allocation3], 0  ;;  %s1251_s0 = inlined_call_operand.hbm [shape: f32[20,128], index: 0, kind: input, shape index: {}]   ;;  %s1252_s1 = inlined_call_operand.hbm [shape: f32[20,128], index: 1, kind: input, shape index: {}]   ;;  %s1253_s2 = inlined_call_operand.hbm [shape: f32[120,128], index: 2, kind: input, shape index: {}]   ;;  %s1254_s3 = inlined_call_operand.hbm [shape: f32[120,128], index: 3, kind: input, shape index: {}]   ;;  %s1255_s4 = inlined_call_operand.hbm [shape: f32[8,128], index: 4, kind: output, shape index: {}]  }
   0x1   :  { %10 = vsyncpa [#allocation6], 0 }
   0x2   :  { %11 = vsyncpa [#allocation9], 0 }
   0x3   :  { %12 = vsyncpa [#allocation4], 0  ;;  %s17_s17 = sshll.u32 %s1251_s0, 4  ;;  %s950_s18 = smov [#allocation2]   ;;  %s18_s17 = int_to_ptr.hbm [resolvable:$true] %s17_s17 }
   0x4   :  { %s19_s19 = sshll.u32 %s950_s18, 4  ;;  %s30_s22 = sshll.u32 %s1252_s1, 4  ;;  %s20_s19 = int_to_ptr.vmem [resolvable:$true] %s19_s19  ;;  %s31_s22 = int_to_ptr.hbm [resolvable:$true] %s30_s22 }
   0x5   :  { %s951_s23 = smov 128   ;;  %s952_s24 = smov 8  }
   0x6   :  { %25 = dma.hbm_to_vmem [thread:$0]  %s18_s17, 384, %s20_s19, [#allocation3], %s951_s23, %s951_s23, %s952_s24  }
   0x7   :  { %s953_s25 = smov [#allocation5]  }
   0x8   :  { %s32_s26 = sshll.u32 %s953_s25, 4  ;;  %s33_s26 = int_to_ptr.vmem [resolvable:$true] %s32_s26 }
   0x9   :  { %38 = dma.hbm_to_vmem [thread:$0]  %s31_s22, 384, %s33_s26, [#allocation6], %s951_s23, %s951_s23, %s952_s24  }
   0xa   :  { %42 = vsyncadd [#allocation6], 384  ;;  %s43_s0 = sshll.u32 %s1253_s2, 4  ;;  %s954_s29 = smov [#allocation7]   ;;  %s44_s0 = int_to_ptr.hbm [resolvable:$true] %s43_s0 }
   0xb   :  { %s45_s30 = sshll.u32 %s954_s29, 4  ;;  %s46_s30 = int_to_ptr.vmem [resolvable:$true] %s45_s30 }
   0xc   :  { %51 = dma.hbm_to_vmem [thread:$0]  %s44_s0, 1920, %s46_s30, [#allocation6], %s951_s23, %s951_s23, %s952_s24  }
   0xd   :  { %55 = vsyncadd [#allocation9], 384  ;;  %s56_s6 = sshll.u32 %s1254_s3, 4  ;;  %s955_s7 = smov [#allocation8]   ;;  %s57_s6 = int_to_ptr.hbm [resolvable:$true] %s56_s6 }
   0xe   :  { %s58_s8 = sshll.u32 %s955_s7, 4  ;;  %s59_s8 = int_to_ptr.vmem [resolvable:$true] %s58_s8 }
   0xf   :  { %64 = dma.hbm_to_vmem [thread:$0]  %s57_s6, 1920, %s59_s8, [#allocation9], %s951_s23, %s951_s23, %s952_s24  }
  0x10   :  { %942 = dma.done.wait [#allocation3], 384  }
  0x11   :  { %943 = vsyncadd [#allocation3], 4294966912 }
  0x12   :  { %944 = dma.done.wait [#allocation6], 2688  }
  0x13   :  { %945 = vsyncadd [#allocation6], 4294964608 }
  0x14   :  { %946 = dma.done.wait [#allocation9], 2304  }
  0x15   :  { %947 = vsyncadd [#allocation9], 4294964992  ;;  %v91_v0 = vld [vmem:[#allocation7 + $0x20] sm:$0xff]  ;;  %v109_v1 = vld [vmem:[#allocation8 + $0x20] sm:$0xff]  ;;  %s958_s2 = smov [#allocation10]   ;;  %s707_s11 = sshll.u32 %s1255_s4, 4  ;;  %s708_s11 = int_to_ptr.hbm [resolvable:$true] %s707_s11 }
  0x16   :  { %v89_v2 = vld [vmem:[#allocation7 + $0x10] sm:$0xff]  ;;  %v139_v3 = vsub.f32 %v91_v0, %v109_v1  ;;  %v107_v4 = vld [vmem:[#allocation8 + $0x10] sm:$0xff]  ;;  %v92_v9 = vld [vmem:[#allocation7 + $0x28] sm:$0xff]  ;;  %s705_s3 = sshll.u32 %s958_s2, 4  ;;  %s706_s3 = int_to_ptr.vmem [resolvable:$true] %s705_s3 }
  0x17   :  { %v87_v5 = vld [vmem:[#allocation7] sm:$0xff]  ;;  %v105_v6 = vld [vmem:[#allocation8] sm:$0xff]  ;;  %v137_v7 = vsub.f32 %v89_v2, %v107_v4  ;;  %v110_v10 = vld [vmem:[#allocation8 + $0x28] sm:$0xff] }
  0x18   :  { %v135_v8 = vsub.f32 %v87_v5, %v105_v6  ;;  %v90_v11 = vld [vmem:[#allocation7 + $0x18] sm:$0xff]  ;;  %v157_v12 = vand.u32 2147483647, %v139_v3  ;;  %v108_v13 = vld [vmem:[#allocation8 + $0x18] sm:$0xff]  ;;  %v140_v18 = vsub.f32 %v92_v9, %v110_v10  ;;  %v95_v22 = vld [vmem:[#allocation7 + $0x40] sm:$0xff] }
  0x19   :  { %v88_v14 = vld [vmem:[#allocation7 + $0x8] sm:$0xff]  ;;  %v106_v15 = vld [vmem:[#allocation8 + $0x8] sm:$0xff]  ;;  %v155_v16 = vand.u32 2147483647, %v137_v7  ;;  %v138_v19 = vsub.f32 %v90_v11, %v108_v13  ;;  %v113_v25 = vld [vmem:[#allocation8 + $0x40] sm:$0xff] }
  0x1a   :  { %v153_v17 = vand.u32 2147483647, %v135_v8  ;;  %179 = vadd.xlane.f32.xlu2 %v157_v12  ;;  %v136_v20 = vsub.f32 %v88_v14, %v106_v15  ;;  %v158_v21 = vand.u32 2147483647, %v140_v18  ;;  %v94_v26 = vld [vmem:[#allocation7 + $0x38] sm:$0xff]  ;;  %v112_v27 = vld [vmem:[#allocation8 + $0x38] sm:$0xff]  ;;  %v143_v30 = vsub.f32 %v95_v22, %v113_v25 }
  0x1b   :  { %175 = vadd.xlane.f32.xlu1 %v155_v16  ;;  %v156_v23 = vand.u32 2147483647, %v138_v19  ;;  %v93_v28 = vld [vmem:[#allocation7 + $0x30] sm:$0xff]  ;;  %v111_v29 = vld [vmem:[#allocation8 + $0x30] sm:$0xff]  ;;  %v142_v31 = vsub.f32 %v94_v26, %v112_v27  ;;  %v98_v34 = vld [vmem:[#allocation7 + $0x58] sm:$0xff] }
  0x1c   :  { %171 = vadd.xlane.f32.xlu0 %v153_v17  ;;  %v154_v24 = vand.u32 2147483647, %v136_v20  ;;  %v141_v32 = vsub.f32 %v93_v28, %v111_v29  ;;  %v161_v33 = vand.u32 2147483647, %v143_v30  ;;  %v116_v37 = vld [vmem:[#allocation8 + $0x58] sm:$0xff]  ;;  %v97_v38 = vld [vmem:[#allocation7 + $0x50] sm:$0xff] }
  0x1d   :  { %v160_v35 = vand.u32 2147483647, %v142_v31  ;;  %v115_v39 = vld [vmem:[#allocation8 + $0x50] sm:$0xff]  ;;  %v96_v40 = vld [vmem:[#allocation7 + $0x48] sm:$0xff]  ;;  %v114_v41 = vld [vmem:[#allocation8 + $0x48] sm:$0xff]  ;;  %v146_v42 = vsub.f32 %v98_v34, %v116_v37 }
  0x1e   :  { %v159_v36 = vand.u32 2147483647, %v141_v32  ;;  %v145_v43 = vsub.f32 %v97_v38, %v115_v39  ;;  %v144_v44 = vsub.f32 %v96_v40, %v114_v41  ;;  %v99_v46 = vld [vmem:[#allocation7 + $0x60] sm:$0xff]  ;;  %v82_v49 = vld [vmem:[#allocation2 + $0x8] sm:$0xff]  ;;  %v85_v50 = vld [vmem:[#allocation5 + $0x8] sm:$0xff] }
  0x1f   :  { %v164_v45 = vand.u32 2147483647, %v146_v42  ;;  %v117_v51 = vld [vmem:[#allocation8 + $0x60] sm:$0xff]  ;;  %v84_v53 = vld [vmem:[#allocation5] sm:$0xff]  ;;  %v124_v54 = vsub.f32 %v82_v49, %v85_v50  ;;  %v119_v62 = vld [vmem:[#allocation8 + $0x70] sm:$0xff] }
  0x20   :  { %v163_v47 = vand.u32 2147483647, %v145_v43  ;;  %v162_v48 = vand.u32 2147483647, %v144_v44  ;;  %v81_v52 = vld [vmem:[#allocation2] sm:$0xff]  ;;  %v147_v55 = vsub.f32 %v99_v46, %v117_v51  ;;  %v100_v58 = vld [vmem:[#allocation7 + $0x68] sm:$0xff] }
  0x21   :  { %v123_v56 = vsub.f32 %v81_v52, %v84_v53  ;;  %v127_v57 = vand.u32 2147483647, %v124_v54  ;;  %v101_v61 = vld [vmem:[#allocation7 + $0x70] sm:$0xff]  ;;  %v118_v63 = vld [vmem:[#allocation8 + $0x68] sm:$0xff]  ;;  %v83_v0 = vld [vmem:[#allocation2 + $0x10] sm:$0xff] }
  0x22   :  { %181 = vadd.xlane.f32.xlu2 %v158_v21  ;;  %v165_v59 = vand.u32 2147483647, %v147_v55  ;;  %v86_v1 = vld [vmem:[#allocation5 + $0x10] sm:$0xff]  ;;  %v149_v2 = vsub.f32 %v101_v61, %v119_v62  ;;  %v148_v3 = vsub.f32 %v100_v58, %v118_v63 }
  0x23   :  { %177 = vadd.xlane.f32.xlu1 %v156_v23  ;;  %v126_v60 = vand.u32 2147483647, %v123_v56  ;;  %v125_v4 = vsub.f32 %v83_v0, %v86_v1 }
  0x24   :  { %173 = vadd.xlane.f32.xlu0 %v154_v24  ;;  %v167_v5 = vand.u32 2147483647, %v149_v2  ;;  %v166_v6 = vand.u32 2147483647, %v148_v3 }
  0x25   :  { %v128_v7 = vand.u32 2147483647, %v125_v4 }
  0x2a   :  { %187 = vadd.xlane.f32.xlu2 %v161_v33 }
  0x2b   :  { %185 = vadd.xlane.f32.xlu1 %v160_v35 }
  0x2c   :  { %183 = vadd.xlane.f32.xlu0 %v159_v36 }
  0x32   :  { %193 = vadd.xlane.f32.xlu2 %v164_v45 }
  0x33   :  { %191 = vadd.xlane.f32.xlu1 %v163_v47 }
  0x34   :  { %189 = vadd.xlane.f32.xlu0 %v162_v48 }
  0x3a   :  { %131 = vadd.xlane.f32.xlu2 %v127_v57 }
  0x3b   :  { %129 = vadd.xlane.f32.xlu1 %v126_v60 }
  0x3c   :  { %195 = vadd.xlane.f32.xlu0 %v165_v59 }
  0x42   :  { %199 = vadd.xlane.f32.xlu2 %v167_v5 }
  0x43   :  { %133 = vadd.xlane.f32.xlu1 %v128_v7 }
  0x44   :  { %197 = vadd.xlane.f32.xlu0 %v166_v6 }
  0x8d   :  { %v180_v8 = vpop.xlane.xlu2 %179 }
  0x8e   :  { %v996_v9 = vadd.f32 -1.0, %v180_v8  ;;  %v176_v10 = vpop.xlane.xlu1 %175 }
  0x8f   :  { %v172_v11 = vpop.xlane.xlu0 %171  ;;  %v998_v12 = vadd.f32 -1.0, %v176_v10 }
  0x90   :  { %v1000_v13 = vadd.f32 -1.0, %v172_v11  ;;  %v298_v14 = vand.u32 2147483647, %v996_v9  ;;  %v280_v53 = vmin.f32 %v996_v9, 0.0 }
  0x91   :  { %v296_v15 = vand.u32 2147483647, %v998_v12  ;;  %v278_v54 = vmin.f32 %v998_v12, 0.0 }
  0x92   :  { %v294_v16 = vand.u32 2147483647, %v1000_v13  ;;  %v316_v17 = vsub.f32 0.0, %v298_v14  ;;  %v276_v55 = vmin.f32 %v1000_v13, 0.0 }
  0x93   :  { %v314_v19 = vsub.f32 0.0, %v296_v15 }
  0x94   :  { %v312_v18 = vsub.f32 0.0, %v294_v16  ;;  %v338_v24 = vmul.f32 1.442695, %v316_v17 }
  0x95   :  { %v182_v20 = vpop.xlane.xlu2 %181  ;;  %v334_v29 = vmul.f32 1.442695, %v314_v19 }
  0x96   :  { %v1005_v21 = vadd.f32 -1.0, %v182_v20  ;;  %v178_v22 = vpop.xlane.xlu1 %177  ;;  %v330_v27 = vmul.f32 1.442695, %v312_v18  ;;  %746 = vpow2.f32 %v338_v24 }
  0x97   :  { %v174_v23 = vpop.xlane.xlu0 %173  ;;  %v1007_v25 = vadd.f32 -1.0, %v178_v22 }
  0x98   :  { %v1009_v26 = vadd.f32 -1.0, %v174_v23  ;;  %v299_v28 = vand.u32 2147483647, %v1005_v21  ;;  %748 = vpow2.f32 %v330_v27  ;;  %v281_v6 = vmin.f32 %v1005_v21, 0.0 }
  0x99   :  { %v297_v30 = vand.u32 2147483647, %v1007_v25  ;;  %750 = vpow2.f32 %v334_v29  ;;  %v279_v7 = vmin.f32 %v1007_v25, 0.0 }
  0x9a   :  { %v295_v31 = vand.u32 2147483647, %v1009_v26  ;;  %v317_v32 = vsub.f32 0.0, %v299_v28  ;;  %v277_v14 = vmin.f32 %v1009_v26, 0.0 }
  0x9b   :  { %v315_v33 = vsub.f32 0.0, %v297_v30 }
  0x9c   :  { %v340_v34 = vmul.f32 1.442695, %v317_v32  ;;  %v313_v35 = vsub.f32 0.0, %v295_v31  ;;  %v1014_v40 = vpop.eup %746 }
  0x9d   :  { %v188_v36 = vpop.xlane.xlu2 %187  ;;  %v336_v37 = vmul.f32 1.442695, %v315_v33  ;;  %v402_v46 = vadd.f32 1.0, %v1014_v40  ;;  %v405_v57 = vmul.f32 -0.5, %v1014_v40  ;;  %v408_v58 = vand.u32 2147483647, %v1014_v40 }
  0x9e   :  { %v186_v38 = vpop.xlane.xlu1 %185  ;;  %752 = vpow2.f32 %v340_v34  ;;  %v332_v41 = vmul.f32 1.442695, %v313_v35  ;;  %v1016_v42 = vpop.eup %748  ;;  %v1018_v43 = vadd.f32 -1.0, %v188_v36 }
  0x9f   :  { %v184_v39 = vpop.xlane.xlu0 %183  ;;  %v1020_v44 = vpop.eup %750  ;;  %v1022_v45 = vadd.f32 -1.0, %v186_v38  ;;  %v366_v48 = vadd.f32 1.0, %v1016_v42  ;;  %v369_v1 = vmul.f32 -0.5, %v1016_v42  ;;  %v372_v5 = vand.u32 2147483647, %v1016_v42 }
  0xa0   :  { %754 = vpow2.f32 %v332_v41  ;;  %v302_v47 = vand.u32 2147483647, %v1018_v43  ;;  %v384_v49 = vadd.f32 1.0, %v1020_v44  ;;  %v387_v61 = vmul.f32 -0.5, %v1020_v44 }
  0xa1   :  { %756 = vpow2.f32 %v336_v37  ;;  %v301_v50 = vand.u32 2147483647, %v1022_v45  ;;  %v390_v62 = vand.u32 2147483647, %v1020_v44  ;;  %v1045_v4 = vadd.f32 -1.0, %v184_v39 }
  0xa2   :  { %v320_v52 = vsub.f32 0.0, %v302_v47  ;;  %758 = vlog2.f32 %v402_v46  ;;  %v406_v18 = vadd.f32 1.0, %v405_v57  ;;  %vm1053_vm0 = vcmp.lt.f32.partialorder %v408_v58, 0.0004427343 }
  0xa3   :  { %760 = vlog2.f32 %v366_v48  ;;  %v319_v59 = vsub.f32 0.0, %v301_v50  ;;  %v388_v20 = vadd.f32 1.0, %v387_v61  ;;  %vm1057_vm1 = vcmp.lt.f32.partialorder %v390_v62, 0.0004427343 }
  0xa4   :  { %v1029_v51 = vpop.eup %752  ;;  %762 = vlog2.f32 %v384_v49  ;;  %v346_v3 = vmul.f32 1.442695, %v320_v52  ;;  %v370_v24 = vadd.f32 1.0, %v369_v1  ;;  %v300_v26 = vand.u32 2147483647, %v1045_v4 }
  0xa5   :  { %v411_v63 = vadd.f32 1.0, %v1029_v51  ;;  %v194_v10 = vpop.xlane.xlu2 %193  ;;  %v344_v15 = vmul.f32 1.442695, %v319_v59  ;;  %vm1064_vm2 = vcmp.lt.f32.partialorder %v372_v5, 0.0004427343  ;;  %v414_v32 = vmul.f32 -0.5, %v1029_v51 }
  0xa6   :  { %v1034_v56 = vpop.eup %754  ;;  %v192_v16 = vpop.xlane.xlu1 %191  ;;  %v1062_v27 = vadd.f32 -1.0, %v194_v10  ;;  %v318_v34 = vsub.f32 0.0, %v300_v26  ;;  %v407_v35 = vmul.f32 %v1014_v40, %v406_v18  ;;  %v417_v37 = vand.u32 2147483647, %v1029_v51 }
  0xa7   :  { %v1038_v60 = vpop.eup %756  ;;  %v190_v0 = vpop.xlane.xlu0 %189  ;;  %v375_v2 = vadd.f32 1.0, %v1034_v56  ;;  %v378_v8 = vmul.f32 -0.5, %v1034_v56  ;;  %v1068_v31 = vadd.f32 -1.0, %v192_v16  ;;  %v381_v33 = vand.u32 2147483647, %v1034_v56 }
  0xa8   :  { %v393_v11 = vadd.f32 1.0, %v1038_v60  ;;  %v759_v17 = vpop.eup %758  ;;  %v1074_v38 = vadd.f32 -1.0, %v190_v0  ;;  %v371_v47 = vmul.f32 %v1016_v42, %v370_v24  ;;  %v305_v48 = vand.u32 2147483647, %v1062_v27 }
  0xa9   :  { %764 = vlog2.f32 %v375_v2  ;;  %v761_v22 = vpop.eup %760  ;;  %v379_v30 = vadd.f32 1.0, %v378_v8  ;;  %v404_v41 = vmul.f32 0.6931472, %v759_v17  ;;  %v396_v50 = vmul.f32 -0.5, %v1038_v60 }
  0xaa   :  { %766 = vlog2.f32 %v411_v63  ;;  %v763_v28 = vpop.eup %762  ;;  %v368_v36 = vmul.f32 0.6931472, %v761_v22  ;;  %v304_v40 = vand.u32 2147483647, %v1068_v31  ;;  %v389_v61 = vmul.f32 %v1020_v44, %v388_v20 }
  0xab   :  { %768 = vpow2.f32 %v346_v3  ;;  %v386_v46 = vmul.f32 0.6931472, %v763_v28  ;;  %v380_v57 = vmul.f32 %v1034_v56, %v379_v30  ;;  %v415_v62 = vadd.f32 1.0, %v414_v32 }
  0xac   :  { %770 = vpow2.f32 %v344_v15  ;;  %vm382_vm3 = vcmp.lt.f32.partialorder %v381_v33, 0.0004427343  ;;  %v342_v63 = vmul.f32 1.442695, %v318_v34  ;;  %v374_v42 = vsel %vm1064_vm2, %v371_v47, %v368_v36 }
  0xad   :  { %772 = vlog2.f32 %v393_v11  ;;  %vm1088_vm4 = vcmp.lt.f32.partialorder %v417_v37, 0.0004427343  ;;  %v303_v2 = vand.u32 2147483647, %v1074_v38  ;;  %v410_v5 = vsel %vm1053_vm0, %v407_v35, %v404_v41  ;;  %v1109_v33 = vpop.xlane.xlu2 %131 }
  0xae   :  { %v323_v8 = vsub.f32 0.0, %v305_v48  ;;  %v392_v11 = vsel %vm1057_vm1, %v389_v61, %v386_v46  ;;  %v397_v15 = vadd.f32 1.0, %v396_v50  ;;  %v322_v17 = vsub.f32 0.0, %v304_v40  ;;  %v1123_v9 = vpop.xlane.xlu1 %129 }
  0xaf   :  { %v765_v39 = vpop.eup %764  ;;  %v196_v58 = vpop.xlane.xlu0 %195  ;;  %v528_v18 = vsub.f32 %v276_v55, %v374_v42  ;;  %v399_v20 = vand.u32 2147483647, %v1038_v60  ;;  %774 = vpow2.f32 %v342_v63  ;;  %v321_v26 = vsub.f32 0.0, %v303_v2 }
  0xb0   :  { %v767_v49 = vpop.eup %766  ;;  %v377_v52 = vmul.f32 0.6931472, %v765_v39  ;;  %v1095_v10 = vadd.f32 -1.0, %v196_v58  ;;  %v530_v23 = vsub.f32 %v278_v54, %v392_v11  ;;  %v352_v29 = vmul.f32 1.442695, %v323_v8 }
  0xb1   :  { %v1081_v59 = vpop.eup %768  ;;  %v413_v19 = vmul.f32 0.6931472, %v767_v49  ;;  %v398_v13 = vmul.f32 %v1038_v60, %v397_v15  ;;  %v350_v55 = vmul.f32 1.442695, %v322_v17  ;;  %v348_v32 = vmul.f32 1.442695, %v321_v26 }
  0xb2   :  { %v1084_v0 = vpop.eup %770  ;;  %v383_v56 = vsel %vm382_vm3, %v380_v57, %v377_v52  ;;  %v438_v16 = vadd.f32 1.0, %v1081_v59  ;;  %v306_v30 = vand.u32 2147483647, %v1095_v10  ;;  %v546_v34 = vsub.f32 0.0, %v528_v18 }
  0xb3   :  { %v773_v3 = vpop.eup %772  ;;  %v529_v44 = vsub.f32 %v277_v14, %v383_v56  ;;  %v429_v22 = vadd.f32 1.0, %v1084_v0  ;;  %v416_v14 = vmul.f32 %v1029_v51, %v415_v62  ;;  %vm1111_vm5 = vcmp.lt.f32.partialorder %v399_v20, 0.0004427343 }
  0xb4   :  { %v395_v24 = vmul.f32 0.6931472, %v773_v3  ;;  %776 = vlog2.f32 %v438_v16  ;;  %v324_v51 = vsub.f32 0.0, %v306_v30  ;;  %v532_v12 = vsub.f32 %v280_v53, %v410_v5 }
  0xb5   :  { %v547_v28 = vsub.f32 0.0, %v529_v44  ;;  %778 = vlog2.f32 %v429_v22  ;;  %v419_v54 = vsel %vm1088_vm4, %v416_v14, %v413_v19  ;;  %v775_v36 = vpop.eup %774  ;;  %v208_v41 = vsub.f32 1.0, %v1109_v33 }
  0xb6   :  { %v401_v60 = vsel %vm1111_vm5, %v398_v13, %v395_v24  ;;  %780 = vpow2.f32 %v348_v32  ;;  %v354_v39 = vmul.f32 1.442695, %v324_v51  ;;  %v548_v46 = vsub.f32 0.0, %v530_v23 }
  0xb7   :  { %v666_v37 = vadd.f32 %v547_v28, %v546_v34  ;;  %782 = vpow2.f32 %v352_v29  ;;  %v432_v47 = vmul.f32 -0.5, %v1084_v0  ;;  %v420_v48 = vadd.f32 1.0, %v775_v36  ;;  %v198_v17 = vpop.xlane.xlu0 %197 }
  0xb8   :  { %784 = vpow2.f32 %v350_v55  ;;  %v1127_v53 = vsub.f32 %v281_v6, %v419_v54  ;;  %v531_v49 = vsub.f32 %v279_v7, %v401_v60  ;;  %v423_v50 = vmul.f32 -0.5, %v775_v36 }
  0xb9   :  { %786 = vpow2.f32 %v354_v39  ;;  %v441_v57 = vmul.f32 -0.5, %v1081_v59  ;;  %v667_v58 = vadd.f32 %v666_v37, %v548_v46  ;;  %v435_v61 = vand.u32 2147483647, %v1084_v0 }
  0xba   :  { %v777_v52 = vpop.eup %776  ;;  %788 = vlog2.f32 %v420_v48  ;;  %v214_v62 = vand.u32 2147483647, %v208_v41  ;;  %v207_v21 = vsub.f32 1.0, %v1123_v9  ;;  %v284_v25 = vmin.f32 %v1018_v43, 0.0 }
  0xbb   :  { %v779_v40 = vpop.eup %778  ;;  %v283_v7 = vmin.f32 %v1022_v45, 0.0  ;;  %v433_v63 = vadd.f32 1.0, %v432_v47  ;;  %v282_v42 = vmin.f32 %v1045_v4, 0.0  ;;  %v550_v56 = vsub.f32 0.0, %v532_v12 }
  0xbc   :  { %v1136_v6 = vpop.eup %780  ;;  %v551_v2 = vsub.f32 0.0, %v1127_v53  ;;  %v549_v3 = vsub.f32 0.0, %v531_v49  ;;  %v424_v5 = vadd.f32 1.0, %v423_v50  ;;  %v442_v8 = vadd.f32 1.0, %v441_v57 }
  0xbd   :  { %v1141_v1 = vpop.eup %782  ;;  %v444_v11 = vand.u32 2147483647, %v1081_v59  ;;  %v426_v15 = vand.u32 2147483647, %v775_v36  ;;  %v447_v16 = vadd.f32 1.0, %v1136_v6  ;;  %v217_v20 = vsub.f32 0.0, %v214_v62 }
  0xbe   :  { %v1144_v44 = vpop.eup %784  ;;  %v668_v18 = vadd.f32 %v667_v58, %v549_v3  ;;  %vm1150_vm6 = vcmp.lt.f32.partialorder %v435_v61, 0.0004427343  ;;  %v213_v22 = vand.u32 2147483647, %v207_v21  ;;  %v431_v14 = vmul.f32 0.6931472, %v779_v40 }
  0xbf   :  { %v1148_v45 = vpop.eup %786  ;;  %v434_v24 = vmul.f32 %v1084_v0, %v433_v63  ;;  %v465_v26 = vadd.f32 1.0, %v1141_v1  ;;  %790 = vlog2.f32 %v447_v16  ;;  %v425_v28 = vmul.f32 %v775_v36, %v424_v5  ;;  %v200_v0 = vpop.xlane.xlu2 %199 }
  0xc0   :  { %v789_v19 = vpop.eup %788  ;;  %v456_v29 = vadd.f32 1.0, %v1144_v44  ;;  %v1159_v30 = vadd.f32 -1.0, %v198_v17  ;;  %v440_v13 = vmul.f32 0.6931472, %v777_v52  ;;  %vm427_vm7 = vcmp.lt.f32.partialorder %v426_v15, 0.0004427343 }
  0xc1   :  { %v422_v23 = vmul.f32 0.6931472, %v789_v19  ;;  %v450_v55 = vmul.f32 -0.5, %v1136_v6  ;;  %v474_v32 = vadd.f32 1.0, %v1148_v45  ;;  %v669_v34 = vadd.f32 %v668_v18, %v550_v56 }
  0xc2   :  { %v221_v51 = vmul.f32 1.442695, %v217_v20  ;;  %v216_v12 = vsub.f32 0.0, %v213_v22  ;;  %v443_v54 = vmul.f32 %v1081_v59, %v442_v8  ;;  %vm1164_vm8 = vcmp.lt.f32.partialorder %v444_v11, 0.0004427343  ;;  %v1184_v8 = vpop.xlane.xlu1 %133 }
  0xc3   :  { %v428_v35 = vsel %vm427_vm7, %v425_v28, %v422_v23  ;;  %v437_v36 = vsel %vm1150_vm6, %v434_v24, %v431_v14  ;;  %792 = vlog2.f32 %v465_v26  ;;  %v307_v46 = vand.u32 2147483647, %v1159_v30 }
  0xc4   :  { %v534_v37 = vsub.f32 %v282_v42, %v428_v35  ;;  %794 = vlog2.f32 %v456_v29  ;;  %v219_v39 = vmul.f32 1.442695, %v216_v12  ;;  %v446_v48 = vsel %vm1164_vm8, %v443_v54, %v440_v13 }
  0xc5   :  { %v791_v47 = vpop.eup %790  ;;  %v451_v53 = vadd.f32 1.0, %v450_v55  ;;  %796 = vlog2.f32 %v474_v32  ;;  %v1173_v59 = vadd.f32 -1.0, %v200_v0  ;;  %v535_v49 = vsub.f32 %v283_v7, %v437_v36 }
  0xc6   :  { %v670_v50 = vadd.f32 %v669_v34, %v551_v2  ;;  %v453_v52 = vand.u32 2147483647, %v1136_v6  ;;  %798 = vpow2.f32 %v221_v51  ;;  %v468_v57 = vmul.f32 -0.5, %v1141_v1 }
  0xc7   :  { %v286_v40 = vmin.f32 %v1068_v31, 0.0  ;;  %v449_v58 = vmul.f32 0.6931472, %v791_v47  ;;  %v325_v61 = vsub.f32 0.0, %v307_v46  ;;  %v552_v62 = vsub.f32 0.0, %v534_v37 }
  0xc8   :  { %v459_v63 = vmul.f32 -0.5, %v1144_v44  ;;  %800 = vpow2.f32 %v219_v39  ;;  %v308_v42 = vand.u32 2147483647, %v1173_v59  ;;  %v536_v7 = vsub.f32 %v284_v25, %v446_v48 }
  0xc9   :  { %v793_v56 = vpop.eup %792  ;;  %v452_v2 = vmul.f32 %v1136_v6, %v451_v53  ;;  %v477_v3 = vmul.f32 -0.5, %v1148_v45  ;;  %v356_v5 = vmul.f32 1.442695, %v325_v61  ;;  %v553_v11 = vsub.f32 0.0, %v535_v49 }
  0xca   :  { %v795_v31 = vpop.eup %794  ;;  %v671_v15 = vadd.f32 %v670_v50, %v552_v62  ;;  %v285_v16 = vmin.f32 %v1074_v38, 0.0  ;;  %vm1187_vm9 = vcmp.lt.f32.partialorder %v453_v52, 0.0004427343  ;;  %v469_v4 = vadd.f32 1.0, %v468_v57 }
  0xcb   :  { %v797_v18 = vpop.eup %796  ;;  %v471_v43 = vand.u32 2147483647, %v1141_v1  ;;  %v455_v6 = vsel %vm1187_vm9, %v452_v2, %v449_v58  ;;  %802 = vpow2.f32 %v356_v5  ;;  %v460_v20 = vadd.f32 1.0, %v459_v63 }
  0xcc   :  { %v1194_v25 = vpop.eup %798  ;;  %v462_v22 = vand.u32 2147483647, %v1144_v44  ;;  %v326_v19 = vsub.f32 0.0, %v308_v42  ;;  %v209_v38 = vsub.f32 1.0, %v1184_v8  ;;  %v554_v14 = vsub.f32 0.0, %v536_v7 }
  0xcd   :  { %v467_v24 = vmul.f32 0.6931472, %v793_v56  ;;  %v478_v26 = vadd.f32 1.0, %v477_v3  ;;  %v480_v23 = vand.u32 2147483647, %v1148_v45  ;;  %v672_v29 = vadd.f32 %v671_v15, %v553_v11 }
  0xce   :  { %v1199_v28 = vpop.eup %800  ;;  %v458_v13 = vmul.f32 0.6931472, %v795_v31  ;;  %v537_v55 = vsub.f32 %v285_v16, %v455_v6  ;;  %v358_v32 = vmul.f32 1.442695, %v326_v19  ;;  %v470_v34 = vmul.f32 %v1141_v1, %v469_v4 }
  0xcf   :  { %vm1202_vm10 = vcmp.lt.f32.partialorder %v471_v43, 0.0004427343  ;;  %v476_v51 = vmul.f32 0.6931472, %v797_v18  ;;  %v234_v12 = vadd.f32 1.0, %v1194_v25  ;;  %v461_v0 = vmul.f32 %v1144_v44, %v460_v20 }
  0xd0   :  { %vm1208_vm11 = vcmp.lt.f32.partialorder %v462_v22, 0.0004427343  ;;  %804 = vpow2.f32 %v358_v32  ;;  %v215_v60 = vand.u32 2147483647, %v209_v38  ;;  %v473_v1 = vsel %vm1202_vm10, %v470_v34, %v467_v24 }
  0xd1   :  { %v803_v36 = vpop.eup %802  ;;  %v479_v37 = vmul.f32 %v1148_v45, %v478_v26  ;;  %vm1217_vm12 = vcmp.lt.f32.partialorder %v480_v23, 0.0004427343  ;;  %v225_v44 = vadd.f32 1.0, %v1199_v28  ;;  %v464_v46 = vsel %vm1208_vm11, %v461_v0, %v458_v13 }
  0xd2   :  { %v673_v47 = vadd.f32 %v672_v29, %v554_v14  ;;  %v555_v48 = vsub.f32 0.0, %v537_v55  ;;  %v483_v53 = vadd.f32 1.0, %v803_v36  ;;  %806 = vlog2.f32 %v234_v12 }
  0xd3   :  { %v482_v49 = vsel %vm1217_vm12, %v479_v37, %v476_v51  ;;  %v486_v50 = vmul.f32 -0.5, %v803_v36  ;;  %v218_v52 = vsub.f32 0.0, %v215_v60  ;;  %v287_v45 = vmin.f32 %v1062_v27, 0.0 }
  0xd4   :  { %v288_v57 = vmin.f32 %v1095_v10, 0.0  ;;  %v237_v58 = vmul.f32 -0.5, %v1194_v25  ;;  %808 = vlog2.f32 %v483_v53  ;;  %v538_v61 = vsub.f32 %v286_v40, %v464_v46 }
  0xd5   :  { %810 = vlog2.f32 %v225_v44  ;;  %v223_v62 = vmul.f32 1.442695, %v218_v52  ;;  %v539_v42 = vsub.f32 %v287_v45, %v473_v1  ;;  %v674_v56 = vadd.f32 %v673_v47, %v555_v48 }
  0xd6   :  { %v805_v63 = vpop.eup %804  ;;  %v540_v7 = vsub.f32 %v288_v57, %v482_v49  ;;  %v240_v2 = vand.u32 2147483647, %v1194_v25  ;;  %v228_v3 = vmul.f32 -0.5, %v1199_v28  ;;  %v487_v5 = vadd.f32 1.0, %v486_v50 }
  0xd7   :  { %v492_v31 = vadd.f32 1.0, %v805_v63  ;;  %812 = vpow2.f32 %v223_v62  ;;  %v211_v27 = vmin.f32 %v208_v41, 0.0  ;;  %v238_v10 = vadd.f32 1.0, %v237_v58 }
  0xd8   :  { %v489_v11 = vand.u32 2147483647, %v803_v36  ;;  %v495_v15 = vmul.f32 -0.5, %v805_v63  ;;  %v807_v40 = vpop.eup %806  ;;  %v556_v16 = vsub.f32 0.0, %v538_v61  ;;  %v289_v17 = vmin.f32 %v1159_v30, 0.0 }
  0xd9   :  { %814 = vlog2.f32 %v492_v31  ;;  %v564_v18 = vlaneseq  ;;  %v557_v43 = vsub.f32 0.0, %v539_v42  ;;  %v558_v6 = vsub.f32 0.0, %v540_v7 }
  0xda   :  { %v809_v4 = vpop.eup %808  ;;  %vm1234_vm13 = vcmp.lt.f32.partialorder %v240_v2, 0.0004427343  ;;  %v290_v22 = vmin.f32 %v1173_v59, 0.0  ;;  %v675_v41 = vadd.f32 %v674_v56, %v556_v16  ;;  %v229_v19 = vadd.f32 1.0, %v228_v3 }
  0xdb   :  { %v811_v33 = vpop.eup %810  ;;  %v485_v14 = vmul.f32 0.6931472, %v809_v4  ;;  %v488_v24 = vmul.f32 %v803_v36, %v487_v5  ;;  %v239_v26 = vmul.f32 %v1194_v25, %v238_v10  ;;  %vm490_vm14 = vcmp.lt.f32.partialorder %v489_v11, 0.0004427343 }
  0xdc   :  { %v496_v30 = vadd.f32 1.0, %v495_v15  ;;  %v231_v29 = vand.u32 2147483647, %v1199_v28  ;;  %v498_v55 = vand.u32 2147483647, %v805_v63  ;;  %v676_v59 = vadd.f32 %v675_v41, %v557_v43 }
  0xdd   :  { %v813_v23 = vpop.eup %812  ;;  %v491_v13 = vsel %vm490_vm14, %v488_v24, %v485_v14  ;;  %v236_v32 = vmul.f32 0.6931472, %v807_v40  ;;  %v227_v34 = vmul.f32 0.6931472, %v811_v33  ;;  %v230_v0 = vmul.f32 %v1199_v28, %v229_v19 }
  0xde   :  { %v541_v35 = vsub.f32 %v289_v17, %v491_v13  ;;  %v243_v51 = vadd.f32 1.0, %v813_v23  ;;  %v246_v54 = vmul.f32 -0.5, %v813_v23  ;;  %v956_v60 = vmov 120.0  }
  0xdf   :  { %v815_v12 = vpop.eup %814  ;;  %816 = vrcp.f32 %v956_v60  ;;  %v497_v1 = vmul.f32 %v805_v63, %v496_v30  ;;  %v677_v37 = vadd.f32 %v676_v59, %v558_v6  ;;  %vm232_vm15 = vcmp.lt.f32.partialorder %v231_v29, 0.0004427343 }
  0xe0   :  { %v559_v36 = vsub.f32 0.0, %v541_v35  ;;  %v494_v25 = vmul.f32 0.6931472, %v815_v12  ;;  %818 = vlog2.f32 %v243_v51  ;;  %vm499_vm0 = vcmp.lt.f32.partialorder %v498_v55, 0.0004427343 }
  0xe1   :  { %v957_v39 = vmov 20.0   ;;  %v242_v44 = vsel %vm1234_vm13, %v239_v26, %v236_v32  ;;  %v210_v46 = vmin.f32 %v207_v21, 0.0  ;;  %v233_v47 = vsel %vm232_vm15, %v230_v0, %v227_v34 }
  0xe2   :  { %820 = vrcp.f32 %v957_v39  ;;  %v500_v28 = vsel %vm499_vm0, %v497_v1, %v494_v25  ;;  %v678_v48 = vadd.f32 %v677_v37, %v559_v36  ;;  %v565_v49 = vshrl.u32 %v564_v18, 7 }
  0xe3   :  { %v542_v53 = vsub.f32 %v290_v22, %v500_v28  ;;  %v247_v50 = vadd.f32 1.0, %v246_v54  ;;  %v249_v52 = vand.u32 2147483647, %v813_v23  ;;  %v253_v57 = vsub.f32 %v211_v27, %v242_v44 }
  0xe4   :  { %v252_v58 = vsub.f32 %v210_v46, %v233_v47  ;;  %v567_v56 = vadd.s32 16, %v565_v49  ;;  %v212_v9 = vmin.f32 %v209_v38, 0.0 }
  0xe5   :  { %v817_v45 = vpop.eup %816  ;;  %v560_v61 = vsub.f32 0.0, %v542_v53  ;;  %v248_v2 = vmul.f32 %v813_v23, %v247_v50  ;;  %vm250_vm1 = vcmp.lt.f32.partialorder %v249_v52, 0.0004427343  ;;  %v256_v3 = vsub.f32 0.0, %v253_v57 }
  0xe6   :  { %v819_v62 = vpop.eup %818  ;;  %v690_v21 = vmul.f32 120.0, %v817_v45  ;;  %v255_v5 = vsub.f32 0.0, %v252_v58  ;;  %vm610_vm2 = vcmp.lt.s32.totalorder %v567_v56, 20  ;;  %vm694_vm3 = vweird.f32 %v817_v45 }
  0xe7   :  { %v679_v42 = vadd.f32 %v678_v48, %v560_v61  ;;  %v245_v7 = vmul.f32 0.6931472, %v819_v62 }
  0xe8   :  { %v821_v63 = vpop.eup %820  ;;  %v691_v16 = vsub.f32 1.0, %v690_v21  ;;  %v650_v17 = vadd.f32 %v256_v3, %v255_v5 }
  0xe9   :  { %v683_v31 = vrot.slane %v679_v42, 4  ;;  %v251_v10 = vsel %vm250_vm1, %v248_v2, %v245_v7  ;;  %v659_v15 = vmul.f32 20.0, %v821_v63  ;;  %vm663_vm4 = vweird.f32 %v821_v63 }
  0xea   :  { %v254_v11 = vsub.f32 %v212_v9, %v251_v10  ;;  %v692_v8 = vmul.f32 %v817_v45, %v691_v16 }
  0xeb   :  { %v684_v27 = vadd.f32 %v683_v31, %v679_v42  ;;  %v660_v43 = vsub.f32 1.0, %v659_v15 }
  0xec   :  { %v257_v40 = vsub.f32 0.0, %v254_v11  ;;  %v693_v19 = vadd.f32 %v817_v45, %v692_v8 }
  0xed   :  { %v685_v18 = vrot.slane %v684_v27, 2  ;;  %v661_v22 = vmul.f32 %v821_v63, %v660_v43 }
  0xee   :  { %v613_v4 = vsel %vm610_vm2, %v257_v40, 0.0  ;;  %v695_v23 = vsel %vm694_vm3, %v817_v45, %v693_v19 }
  0xef   :  { %v686_v6 = vadd.f32 %v685_v18, %v684_v27  ;;  %v651_v20 = vadd.f32 %v650_v17, %v613_v4  ;;  %v662_v24 = vadd.f32 %v821_v63, %v661_v22 }
  0xf1   :  { %v652_v38 = vrot.slane %v651_v20, 4  ;;  %v687_v41 = vrot.slane %v686_v6, 1  ;;  %v664_v13 = vsel %vm663_vm4, %v821_v63, %v662_v24 }
  0xf3   :  { %v653_v33 = vadd.f32 %v652_v38, %v651_v20  ;;  %v688_v30 = vadd.f32 %v687_v41, %v686_v6 }
  0xf5   :  { %v654_v14 = vrot.slane %v653_v33, 2  ;;  %v696_v32 = vmul.f32 %v695_v23, %v688_v30 }
  0xf7   :  { %v655_v26 = vadd.f32 %v654_v14, %v653_v33 }
  0xf9   :  { %v656_v29 = vrot.slane %v655_v26, 1 }
  0xfb   :  { %v657_v55 = vadd.f32 %v656_v29, %v655_v26 }
  0xfd   :  { %v665_v34 = vmul.f32 %v664_v13, %v657_v55 }
  0xff   :  { %v697_v35 = vadd.f32 %v696_v32, %v665_v34 }
 0x101   :  { %v698_v51 = vmul.f32 0.5, %v697_v35 }
 0x103   :  { %699 = vst [vmem:[#allocation10] sm:$0xff] %v698_v51 }
 0x104   :  { %710 = dma.vmem_to_hbm [thread:$0]  %s706_s3, 128, %s708_s11, [#allocation4]  }
 0x105   :  { %948 = dma.done.wait [#allocation4], 128  }
 0x106   :  { %949 = vsyncadd [#allocation4], 4294967168 }
 0x107   :  { %715 = vsyncpa [#allocation3], 1 }
 0x108   :  { %716 = vsyncpa [#allocation6], 1 }
 0x109   :  { %717 = vsyncpa [#allocation9], 1 }
 0x10a   :  { %718 = vsyncpa [#allocation4], 1 }

</bundles_post_ra>
